<compile_context>
chip_gen: v7x
topology: tpu7x:2x2x1
jax: 0.10.0
libtpu: 0.0.40
codegen_flags: <defaults>
</compile_context>

<pallas_src>
import functools
import math

import jax
import jax.numpy as jnp
from jax.experimental import pallas as pl
from jax.experimental.pallas import tpu as pltpu


_LANE_CANDIDATES = (2048, 1024, 512, 256, 128)
_DEFAULT_BLOCK_BYTES = 4 << 20   # 4 MiB per block; x4 (in+out double-buffered) = 16 MiB
_SMALL_TENSOR_BYTES = 1 << 20    # below ~1 MiB the pallas launch overhead dominates


def _copy_kernel(x_ref, o_ref):
    # Straight identity copy of the current (tile_r, lanes) tile.
    o_ref[...] = x_ref[...]


def _plan_copy(total, dtype, block_bytes):
    """Pick a sublane/lane-dense (rows, lanes) view of `total` elements + row tile.

    Returns (rows, lanes, tile_r) or None (caller falls back to metadata-only
    reshape, which is semantically identical).
    """
    itemsize = jnp.dtype(dtype).itemsize
    sublane = 8 * max(1, 4 // itemsize)  # rows per vreg for packed dtypes

    # Widest lane dim; prefer one that also leaves a sublane-dense row count.
    lanes = next(
        (c for c in _LANE_CANDIDATES
         if total % c == 0 and (total // c) % sublane == 0),
        None,
    )
    if lanes is None:
        lanes = next((c for c in _LANE_CANDIDATES if total % c == 0), None)
    if lanes is None:
        return None

    rows = total // lanes
    budget_rows = max(1, block_bytes // (lanes * itemsize))

    if rows <= budget_rows:
        # Whole thing fits in one block (block == full dim is always legal).
        # Split into two row tiles when it divides cleanly so a "parallel"
        # grid has >=2 steps for v7x's two TensorCores (negligible cost on
        # single-TC v5e/v6e).
        if rows % (2 * sublane) == 0:
            return rows, lanes, rows // 2
        return rows, lanes, rows

    # Need a sublane-aligned tile that divides rows exactly.
    if rows % sublane != 0:
        return None
    tile_r = (budget_rows // sublane) * sublane
    while tile_r >= sublane:
        if rows % tile_r == 0:
            return rows, lanes, tile_r
        tile_r -= sublane
    return None


@functools.partial(jax.jit, static_argnames=("out_shape", "block_bytes", "min_bytes"))
def _reshape_materialize(x, *, out_shape,
                         block_bytes=_DEFAULT_BLOCK_BYTES,
                         min_bytes=_SMALL_TENSOR_BYTES):
    """Reshape + materialize into a fresh buffer via a Pallas identity copy."""
    total = int(x.size)
    itemsize = jnp.dtype(x.dtype).itemsize
    nbytes = total * itemsize

    # Small-tensor bypass: the copy is a strict loss vs. launch overhead.
    if nbytes < min_bytes:
        return jnp.reshape(x, out_shape)

    plan = _plan_copy(total, x.dtype, block_bytes)
    if plan is None:
        # No lane-aligned factorization: reshape is free metadata anyway.
        return jnp.reshape(x, out_shape)

    rows, lanes, tile_r = plan

    # Raise the scoped-VMEM limit only when the blocks actually need it
    # (keeps v5e's 16 MiB default safe; 48 MiB fits v7x's 64 MiB physical).
    vmem_need = 4 * tile_r * lanes * itemsize
    compiler_kwargs = dict(dimension_semantics=("parallel",))
    if vmem_need > (12 << 20):
        compiler_kwargs["vmem_limit_bytes"] = min(48 << 20, vmem_need + (8 << 20))

    # Glue: flatten to a sublane/lane-dense 2-D stream (row-major, same order
    # as torch.reshape) — metadata only.
    x2d = jnp.reshape(x, (rows, lanes))

    y2d = pl.pallas_call(
        _copy_kernel,
        out_shape=jax.ShapeDtypeStruct((rows, lanes), x.dtype),
        grid_spec=pltpu.PrefetchScalarGridSpec(
            num_scalar_prefetch=0,
            grid=(rows // tile_r,),
            in_specs=[pl.BlockSpec((tile_r, lanes), lambda i: (i, 0))],
            out_specs=pl.BlockSpec((tile_r, lanes), lambda i: (i, 0)),
        ),
        cost_estimate=pl.CostEstimate(
            flops=0,
            transcendentals=0,
            bytes_accessed=2 * nbytes,
        ),
        compiler_params=pltpu.CompilerParams(**compiler_kwargs),
    )(x2d)

    # Glue: final shape change (metadata only).
    return jnp.reshape(y2d, out_shape)


class Reshape:
    """JAX/Pallas port of zeronn.Reshape (forward only)."""

    def __init__(self, *shape, materialize=False):
        self.shape = tuple(shape)
        self.x_shape = None
        # When True, forward routes through the Pallas identity-copy kernel;
        # the default is the metadata-only reshape (zero-cost on TPU).
        self.materialize = materialize

    def _resolve_out_shape(self, x):
        batch = int(x.shape[0])
        out = (batch,) + self.shape
        if -1 in out:  # torch.reshape-style wildcard (fixed: positive divisor)
            known = int(math.prod(d for d in out if d != -1))
            out = tuple(int(x.size) // known if d == -1 else d for d in out)
        return out

    def forward(self, x, is_t):
        if is_t:
            self.x_shape = tuple(x.shape)
        out_shape = self._resolve_out_shape(x)
        if self.materialize:
            return _reshape_materialize(x, out_shape=out_shape)
        # Metadata-only: the fastest possible "kernel" for a reshape.
        return jnp.reshape(x, out_shape)

    def __call__(self, x, is_t):
        return self.forward(x, is_t)


if __name__ == "__main__":
    key = jax.random.PRNGKey(0)
    # NCHW input, like a PyTorch conv feature map.
    x = jax.random.normal(key, (2, 4, 16, 16), dtype=jnp.float32)

    # Reshape(4, 256): (2, 4, 16, 16) -> (2, 4, 256), default metadata-only path.
    mod = Reshape(4, 256)
    y = mod(x, is_t=True)
    jax.block_until_ready(y)

    y_ref = jnp.reshape(x, (2, 4, 256))
    assert y.shape == (2, 4, 256), y.shape
    assert y.dtype == x.dtype
    assert bool(jnp.all(y == y_ref))
    assert mod.x_shape == (2, 4, 16, 16)

    # Run the Pallas materializing copy once (min_bytes=0 to bypass the
    # small-tensor gate for this intentionally small demo input).
    y_mat = _reshape_materialize(x, out_shape=(2, 4, 256), min_bytes=0)
    jax.block_until_ready(y_mat)
    assert y_mat.shape == (2, 4, 256)
    assert bool(jnp.all(y_mat == y_ref))

    # -1 wildcard (previously produced a negative dim).
    y_wild = Reshape(-1)(x, is_t=False)
    assert y_wild.shape == (2, 1024), y_wild.shape
    assert bool(jnp.all(y_wild == jnp.reshape(x, (2, 1024))))

    # Fallback path: element count with no lane-aligned factorization.
    x_odd = jax.random.normal(key, (2, 3, 5, 5), dtype=jnp.float32)
    y_odd = _reshape_materialize(x_odd, out_shape=(2, 75), min_bytes=0)
    jax.block_until_ready(y_odd)
    assert y_odd.shape == (2, 75)
    assert bool(jnp.all(y_odd == jnp.reshape(x_odd, (2, 75))))

    print("KERNEL_OK")
</pallas_src>

<mosaic_0001>
module attributes {stable_mosaic.version = 11 : i64} {
  func.func @_copy_kernel(%arg0: i32, %arg1: memref<8x256xf32, #tpu.memory_space<vmem>>, %arg2: memref<8x256xf32, #tpu.memory_space<vmem>>) attributes {dimension_semantics = [#tpu.dimension_semantics<parallel>], iteration_bounds = array<i64: 1>, scalar_prefetch = 0 : i64, scratch_operands = 0 : i64, tpu.core_type = #tpu.core_type<tc>, window_params = [{transform_indices = @transform_0, window_bounds = array<i64: 8, 256>}, {transform_indices = @transform_1, window_bounds = array<i64: 8, 256>}]} {
    %c0 = arith.constant 0 : index
    %c0_0 = arith.constant 0 : index
    %0 = vector.load %arg1[%c0, %c0_0] : memref<8x256xf32, #tpu.memory_space<vmem>>, vector<8x256xf32>
    %c0_1 = arith.constant 0 : index
    %c0_2 = arith.constant 0 : index
    %1 = vector.load %arg2[%c0_1, %c0_2] : memref<8x256xf32, #tpu.memory_space<vmem>>, vector<8x256xf32>
    tpu.vector_store %arg2[%c0_1, %c0_2], %0 {strides = array<i32>} : memref<8x256xf32, #tpu.memory_space<vmem>>, vector<8x256xf32>,
    return
  }
  func.func @transform_0(%arg0: i32) -> (i32, i32) {
    %c0_i32 = arith.constant 0 : i32
    %c0_i32_0 = arith.constant 0 : i32
    return %arg0, %c0_i32 : i32, i32
  }
  func.func @transform_1(%arg0: i32) -> (i32, i32) {
    %c0_i32 = arith.constant 0 : i32
    %c0_i32_0 = arith.constant 0 : i32
    return %arg0, %c0_i32 : i32, i32
  }
}

</mosaic_0001>

<bundles_post_ra>
// kernel: _reshape_materialize.1
= control target key start
LH: loop header
LB: loop body
LE: loop exit
PB: predicated region body
PF: predicated region fallthrough
CT: control target
= control target key end

     0   :  { %s38_s0 = inlined_call_operand.vmem [shape: f32[8,256], index: 0, kind: input, shape index: {}]   ;;  %s39_s1 = inlined_call_operand.vmem [shape: f32[8,256], index: 1, kind: output, shape index: {}]  }
   0x1   :  { %v8_v0 = vld [vmem:[%s38_s0] sm:$0xff]  ;;  %v9_v1 = vld [vmem:[%s38_s0 + $0x8] sm:$0xff] }
   0x2   :  { %10 = vst [vmem:[%s39_s1] sm:$0xff] %v8_v0  ;;  %11 = vst [vmem:[%s39_s1 + $0x8] sm:$0xff] %v9_v1 }

</bundles_post_ra>
